<compile_context>
chip_gen: v6e
topology: v6e:2x2x1
jax: 0.10.0
libtpu: 0.0.40
codegen_flags: <defaults>
</compile_context>

<pallas_src>
import functools
import math

import jax
import jax.numpy as jnp
import numpy as np
from jax import lax
from jax.experimental import pallas as pl
from jax.experimental.pallas import tpu as pltpu


# ----------------------------------------------------------------------------
# Kernel: one (batch, L-tile) step; static loop over heads inside the kernel.
#   q_ref : (1, H, TL, Dh) bf16  (q pre-scaled by 1/sqrt(Dh))
#   k_ref : (1, H, S,  Dh) bf16  (resident across L-tiles)
#   v_ref : (1, H, S,  Dh) bf16  (resident across L-tiles)
#   mask  : (1, 1, S) f32 additive mask (only when has_mask)
#   o_ref : (1, TL, E) f32       (lane-dense merged-head output)
#   w_ref : (1, TL, S) f32       (head-averaged weights, only when need_weights)
# ----------------------------------------------------------------------------
def _mha_kernel(*refs, num_heads, head_dim, has_mask, need_weights):
    q_ref, k_ref, v_ref = refs[0], refs[1], refs[2]
    nxt = 3
    mask_ref = None
    if has_mask:
        mask_ref = refs[nxt]
        nxt += 1
    o_ref = refs[nxt]
    nxt += 1
    w_ref = refs[nxt] if need_weights else None

    H, Dh = num_heads, head_dim
    m = mask_ref[0] if has_mask else None            # (1, S) f32

    w_acc = None
    for h in range(H):                               # static head loop
        q = q_ref[0, h]                              # (TL, Dh) bf16
        k = k_ref[0, h]                              # (S,  Dh) bf16
        v = v_ref[0, h]                              # (S,  Dh) bf16

        # scores: contract last axes directly (no k transpose / XLU pass)
        s = lax.dot_general(q, k, (((1,), (1,)), ((), ())),
                            preferred_element_type=jnp.float32)   # (TL, S) f32
        if has_mask:
            s = s + m

        # numerically stable softmax (f32).  Fully-masked rows give NaN,
        # matching PyTorch's behavior.
        s_max = jnp.max(s, axis=-1, keepdims=True)
        p = jnp.exp(s - s_max)                                     # (TL, S) f32
        denom = jnp.sum(p, axis=-1, keepdims=True)                 # (TL, 1)

        if need_weights:
            # exact reciprocal so returned weight rows sum to 1
            w_h = p * (1.0 / denom)                                # (TL, S) f32
            o_h = jnp.dot(w_h.astype(v.dtype), v,
                          preferred_element_type=jnp.float32)      # (TL, Dh)
            w_acc = w_h if w_acc is None else w_acc + w_h
        else:
            # deferred normalization: PV on unnormalized p, scale (TL, Dh) only
            o_h = jnp.dot(p.astype(v.dtype), v,
                          preferred_element_type=jnp.float32)
            o_h = o_h * pl.reciprocal(denom, approx=True)

        # static lane slice of the lane-dense (TL, E) output block
        o_ref[0, :, h * Dh:(h + 1) * Dh] = o_h.astype(o_ref.dtype)

    if need_weights:
        # single store; 1/H folded here (no RMW of the resident block)
        w_ref[0] = w_acc * (1.0 / H)


# ----------------------------------------------------------------------------
# VMEM budget / tile selection (per-generation: v7x 64 MiB vs v5e/v6e 128 MiB)
# ----------------------------------------------------------------------------
def _vmem_limit_bytes():
    try:
        cap = int(pltpu.get_tpu_info().vmem_capacity_bytes)
    except Exception:
        cap = 64 * 1024 * 1024      # conservative (v7x) fallback
    return int(min(cap * 3 // 4, 100 * 1024 * 1024))


def _choose_q_tile(H, S, Dh, vmem_limit):
    E = H * Dh
    kv_bytes = 2 * 2 * H * S * Dh * 2         # K + V blocks, 2 buffers, bf16

    def footprint(tl):
        q_b = 2 * tl * E * 2                  # q block, 2 buffers, bf16
        o_b = 2 * tl * E * 4                  # f32 output block
        w_b = 2 * tl * S * 4                  # f32 weights block
        tmp = 6 * tl * S * 4                  # scores / p / accumulator temps
        return kv_bytes + q_b + o_b + w_b + tmp

    tl = 512
    while tl > 128 and footprint(tl) > int(vmem_limit * 0.8):
        tl //= 2
    return tl


# ----------------------------------------------------------------------------
# pallas_call wrapper
#   qh/kh/vh : (B, H, L_or_S, Dh) bf16 (q already scaled by 1/sqrt(Dh))
#   add_mask : (B, 1, S) f32 additive mask, or None
# returns (out (B, L, E) f32, weights (B, L, S) f32 or None)
# ----------------------------------------------------------------------------
def _attention_pallas(qh, kh, vh, add_mask, *, need_weights=True, q_tile=None):
    B, H, L, Dh = qh.shape
    S = kh.shape[2]
    E = H * Dh

    vmem_limit = _vmem_limit_bytes()
    TL = q_tile if q_tile is not None else _choose_q_tile(H, S, Dh, vmem_limit)
    if L <= TL:
        TL = L
    # ragged L: pad to a multiple of TL (TL is a multiple of 8 when TL < L)
    Lp = ((L + TL - 1) // TL) * TL
    if Lp != L:
        qh = jnp.pad(qh, ((0, 0), (0, 0), (0, Lp - L), (0, 0)))
    nL = Lp // TL

    has_mask = add_mask is not None

    q_spec = pl.BlockSpec((1, H, TL, Dh), lambda b, l: (b, 0, l, 0))
    kv_spec = pl.BlockSpec((1, H, S, Dh), lambda b, l: (b, 0, 0, 0))  # resident
    o_spec = pl.BlockSpec((1, TL, E), lambda b, l: (b, l, 0))

    in_specs = [q_spec, kv_spec, kv_spec]
    inputs = [qh, kh, vh]
    if has_mask:
        in_specs.append(pl.BlockSpec((1, 1, S), lambda b, l: (b, 0, 0)))
        inputs.append(add_mask)

    if need_weights:
        out_shape = (jax.ShapeDtypeStruct((B, Lp, E), jnp.float32),
                     jax.ShapeDtypeStruct((B, Lp, S), jnp.float32))
        out_specs = [o_spec, pl.BlockSpec((1, TL, S), lambda b, l: (b, l, 0))]
    else:
        out_shape = jax.ShapeDtypeStruct((B, Lp, E), jnp.float32)
        out_specs = o_spec

    kernel = functools.partial(_mha_kernel, num_heads=H, head_dim=Dh,
                               has_mask=has_mask, need_weights=need_weights)

    result = pl.pallas_call(
        kernel,
        out_shape=out_shape,
        grid_spec=pltpu.PrefetchScalarGridSpec(
            num_scalar_prefetch=0,
            grid=(B, nL),
            in_specs=in_specs,
            out_specs=out_specs,
        ),
        compiler_params=pltpu.CompilerParams(
            dimension_semantics=("parallel", "parallel"),
            vmem_limit_bytes=vmem_limit,
        ),
    )(*inputs)

    if need_weights:
        out, w = result
    else:
        out, w = result, None
    if Lp != L:
        out = out[:, :L]
        if w is not None:
            w = w[:, :L]
    return out, w


# ----------------------------------------------------------------------------
# MHA module (parameters held as plain arrays; projections are XLA GEMMs,
# the attention hot path runs in the Pallas kernel above).
# ----------------------------------------------------------------------------
class MHAPallas:
    def __init__(self, num_heads, d_embed, key):
        assert d_embed % num_heads == 0
        self.num_heads = num_heads
        self.d_embed = d_embed
        self.head_dim = d_embed // num_heads

        k1, k2, k3, k4 = jax.random.split(key, 4)
        # Same parameterization as nn.MultiheadAttention:
        #   in_proj_weight (3E, E), in_proj_bias (3E,)
        #   out_proj.weight (E, E), out_proj.bias (E,)
        bound = 1.0 / math.sqrt(d_embed)
        self.in_proj_weight = jax.random.uniform(
            k1, (3 * d_embed, d_embed), jnp.float32, -bound, bound)
        self.in_proj_bias = jax.random.uniform(
            k2, (3 * d_embed,), jnp.float32, -bound, bound)
        self.out_proj_weight = jax.random.uniform(
            k3, (d_embed, d_embed), jnp.float32, -bound, bound)
        self.out_proj_bias = jax.random.uniform(
            k4, (d_embed,), jnp.float32, -bound, bound)

    def __call__(self, query, key, value, key_padding_mask=None,
                 need_weights=True, q_tile=None):
        """query: (B, L, E), key/value: (B, S, E),
        key_padding_mask: optional bool (B, S), True = ignore."""
        B, L, E = query.shape
        _, S, _ = key.shape
        H, Dh = self.num_heads, self.head_dim

        wq, wk, wv = jnp.split(self.in_proj_weight, 3, axis=0)
        bq, bk, bv = jnp.split(self.in_proj_bias, 3, axis=0)

        scale = 1.0 / math.sqrt(Dh)
        q = (query @ wq.T + bq) * scale   # fold softmax scale into q
        k = key @ wk.T + bk
        v = value @ wv.T + bv

        # head-major (B, H, T, Dh), bf16 for the MXU
        # TODO(synk): fuse the projections / head-split transposes into the kernel.
        qh = q.reshape(B, L, H, Dh).transpose(0, 2, 1, 3).astype(jnp.bfloat16)
        kh = k.reshape(B, S, H, Dh).transpose(0, 2, 1, 3).astype(jnp.bfloat16)
        vh = v.reshape(B, S, H, Dh).transpose(0, 2, 1, 3).astype(jnp.bfloat16)

        if key_padding_mask is None:
            add_mask = None                      # maskless kernel variant
        else:
            add_mask = jnp.where(
                key_padding_mask[:, None, :], -jnp.inf, 0.0).astype(jnp.float32)

        attn_out, attn_weights = _attention_pallas(
            qh, kh, vh, add_mask, need_weights=need_weights, q_tile=q_tile)

        # kernel output is already merged-head (B, L, E); no transpose needed
        attn_out = attn_out @ self.out_proj_weight.T + self.out_proj_bias
        return attn_out, attn_weights


# ----------------------------------------------------------------------------
# Pure-JAX f32 reference for a correctness sanity check.
# ----------------------------------------------------------------------------
def _reference(mha, query, key, value, key_padding_mask):
    B, L, E = query.shape
    _, S, _ = key.shape
    H, Dh = mha.num_heads, mha.head_dim
    wq, wk, wv = jnp.split(mha.in_proj_weight, 3, axis=0)
    bq, bk, bv = jnp.split(mha.in_proj_bias, 3, axis=0)
    q = (query @ wq.T + bq).reshape(B, L, H, Dh).transpose(0, 2, 1, 3)
    k = (key @ wk.T + bk).reshape(B, S, H, Dh).transpose(0, 2, 1, 3)
    v = (value @ wv.T + bv).reshape(B, S, H, Dh).transpose(0, 2, 1, 3)
    s = jnp.einsum("bhld,bhsd->bhls", q, k) / math.sqrt(Dh)
    if key_padding_mask is not None:
        s = jnp.where(key_padding_mask[:, None, None, :], -jnp.inf, s)
    w = jax.nn.softmax(s, axis=-1)
    o = jnp.einsum("bhls,bhsd->bhld", w, v)
    o = o.transpose(0, 2, 1, 3).reshape(B, L, E)
    o = o @ mha.out_proj_weight.T + mha.out_proj_bias
    return o, w.mean(axis=1)


if __name__ == "__main__":
    B, L, S, E, H = 2, 8, 8, 32, 4

    root = jax.random.PRNGKey(0)
    kp, kq, kk, kv = jax.random.split(root, 4)

    mha = MHAPallas(num_heads=H, d_embed=E, key=kp)

    query = jax.random.normal(kq, (B, L, E), jnp.float32)
    key = jax.random.normal(kk, (B, S, E), jnp.float32)
    value = jax.random.normal(kv, (B, S, E), jnp.float32)
    # key_padding_mask: mask out the last two key positions of batch 1
    key_padding_mask = jnp.zeros((B, S), bool).at[1, -2:].set(True)

    # 1) masked, need_weights=True
    attn_out, attn_weights = mha(query, key, value, key_padding_mask)
    jax.block_until_ready((attn_out, attn_weights))
    ref_out, ref_w = _reference(mha, query, key, value, key_padding_mask)
    np.testing.assert_allclose(np.asarray(attn_out), np.asarray(ref_out),
                               rtol=5e-2, atol=5e-2)
    np.testing.assert_allclose(np.asarray(attn_weights), np.asarray(ref_w),
                               rtol=5e-2, atol=5e-2)

    # 2) masked, need_weights=False fast path (deferred normalization)
    out_nw, w_nw = mha(query, key, value, key_padding_mask, need_weights=False)
    jax.block_until_ready(out_nw)
    assert w_nw is None
    np.testing.assert_allclose(np.asarray(out_nw), np.asarray(ref_out),
                               rtol=5e-2, atol=5e-2)

    # 3) maskless + ragged L (exercises the padded multi-tile grid path)
    L2 = 12
    query2 = jax.random.normal(jax.random.PRNGKey(7), (B, L2, E), jnp.float32)
    out2, w2 = mha(query2, key, value, None, q_tile=8)
    jax.block_until_ready((out2, w2))
    ref_out2, ref_w2 = _reference(mha, query2, key, value, None)
    np.testing.assert_allclose(np.asarray(out2), np.asarray(ref_out2),
                               rtol=5e-2, atol=5e-2)
    np.testing.assert_allclose(np.asarray(w2), np.asarray(ref_w2),
                               rtol=5e-2, atol=5e-2)

    print("KERNEL_OK")
</pallas_src>

<mosaic_0001>
module attributes {stable_mosaic.version = 11 : i64} {
  func.func @_mha_kernel(%arg0: i32, %arg1: i32, %arg2: memref<1x4x8x8xbf16, #tpu.memory_space<vmem>>, %arg3: memref<1x4x8x8xbf16, #tpu.memory_space<vmem>>, %arg4: memref<1x4x8x8xbf16, #tpu.memory_space<vmem>>, %arg5: memref<1x1x8xf32, #tpu.memory_space<vmem>>, %arg6: memref<1x8x32xf32, #tpu.memory_space<vmem>>, %arg7: memref<1x8x8xf32, #tpu.memory_space<vmem>>) attributes {dimension_semantics = [#tpu.dimension_semantics<parallel>, #tpu.dimension_semantics<parallel>], iteration_bounds = array<i64: 2, 1>, scalar_prefetch = 0 : i64, scratch_operands = 0 : i64, tpu.core_type = #tpu.core_type<tc>, window_params = [{transform_indices = @transform_0, window_bounds = array<i64: 1, 4, 8, 8>}, {transform_indices = @transform_1, window_bounds = array<i64: 1, 4, 8, 8>}, {transform_indices = @transform_2, window_bounds = array<i64: 1, 4, 8, 8>}, {transform_indices = @transform_3, window_bounds = array<i64: 1, 1, 8>}, {transform_indices = @transform_4, window_bounds = array<i64: 1, 8, 32>}, {transform_indices = @transform_5, window_bounds = array<i64: 1, 8, 8>}]} {
    %c0 = arith.constant 0 : index
    %c0_0 = arith.constant 0 : index
    %c0_1 = arith.constant 0 : index
    %0 = vector.load %arg5[%c0, %c0_0, %c0_1] : memref<1x1x8xf32, #tpu.memory_space<vmem>>, vector<1x1x8xf32>
    %1 = vector.shape_cast %0 : vector<1x1x8xf32> to vector<1x8xf32>
    %c0_2 = arith.constant 0 : index
    %c0_3 = arith.constant 0 : index
    %c0_4 = arith.constant 0 : index
    %c0_5 = arith.constant 0 : index
    %2 = vector.load %arg2[%c0_2, %c0_3, %c0_4, %c0_5] : memref<1x4x8x8xbf16, #tpu.memory_space<vmem>>, vector<1x1x8x8xbf16>
    %3 = vector.shape_cast %2 : vector<1x1x8x8xbf16> to vector<8x8xbf16>
    %c0_6 = arith.constant 0 : index
    %c0_7 = arith.constant 0 : index
    %c0_8 = arith.constant 0 : index
    %c0_9 = arith.constant 0 : index
    %4 = vector.load %arg3[%c0_6, %c0_7, %c0_8, %c0_9] : memref<1x4x8x8xbf16, #tpu.memory_space<vmem>>, vector<1x1x8x8xbf16>
    %5 = vector.shape_cast %4 : vector<1x1x8x8xbf16> to vector<8x8xbf16>
    %c0_10 = arith.constant 0 : index
    %c0_11 = arith.constant 0 : index
    %c0_12 = arith.constant 0 : index
    %c0_13 = arith.constant 0 : index
    %6 = vector.load %arg4[%c0_10, %c0_11, %c0_12, %c0_13] : memref<1x4x8x8xbf16, #tpu.memory_space<vmem>>, vector<1x1x8x8xbf16>
    %7 = vector.shape_cast %6 : vector<1x1x8x8xbf16> to vector<8x8xbf16>
    %cst = arith.constant dense<0.000000e+00> : vector<8x8xf32>
    %8 = tpu.matmul %3, %5, %cst {dimension_numbers = #tpu.dot_dimension_numbers<[1], [1], [0], [0], [0, 0, 1, 0], [], []>} : vector<8x8xbf16>, vector<8x8xbf16>, vector<8x8xf32> -> vector<8x8xf32>
    %9 = vector.broadcast %1 : vector<1x8xf32> to vector<8x8xf32>
    %10 = arith.addf %8, %9 : vector<8x8xf32>
    %cst_14 = arith.constant dense<0xFF800000> : vector<8xf32>
    %11 = vector.multi_reduction <maximumf>, %10, %cst_14 [1] : vector<8x8xf32> to vector<8xf32>
    %12 = vector.shape_cast %11 : vector<8xf32> to vector<8x1xf32>
    %13 = vector.broadcast %12 : vector<8x1xf32> to vector<8x8xf32>
    %14 = arith.subf %10, %13 : vector<8x8xf32>
    %15 = math.exp %14 : vector<8x8xf32>
    %cst_15 = arith.constant dense<0.000000e+00> : vector<8xf32>
    %16 = vector.multi_reduction <add>, %15, %cst_15 [1] : vector<8x8xf32> to vector<8xf32>
    %17 = vector.shape_cast %16 : vector<8xf32> to vector<8x1xf32>
    %cst_16 = arith.constant 1.000000e+00 : f32
    %18 = vector.broadcast %cst_16 : f32 to vector<8x1xf32>
    %19 = arith.divf %18, %17 : vector<8x1xf32>
    %20 = vector.broadcast %19 : vector<8x1xf32> to vector<8x8xf32>
    %21 = arith.mulf %15, %20 : vector<8x8xf32>
    %22 = arith.truncf %21 : vector<8x8xf32> to vector<8x8xbf16>
    %cst_17 = arith.constant dense<0.000000e+00> : vector<8x8xf32>
    %23 = tpu.matmul %22, %7, %cst_17 {dimension_numbers = #tpu.dot_dimension_numbers<[1], [0], [0], [1], [0, 0, 1, 1], [], []>} : vector<8x8xbf16>, vector<8x8xbf16>, vector<8x8xf32> -> vector<8x8xf32>
    %c0_18 = arith.constant 0 : index
    %c0_19 = arith.constant 0 : index
    %c0_20 = arith.constant 0 : index
    %24 = vector.load %arg6[%c0_18, %c0_19, %c0_20] : memref<1x8x32xf32, #tpu.memory_space<vmem>>, vector<1x8x8xf32>
    %25 = vector.shape_cast %24 : vector<1x8x8xf32> to vector<8x8xf32>
    %26 = vector.shape_cast %23 : vector<8x8xf32> to vector<1x8x8xf32>
    tpu.vector_store %arg6[%c0_18, %c0_19, %c0_20], %26 {strides = array<i32>} : memref<1x8x32xf32, #tpu.memory_space<vmem>>, vector<1x8x8xf32>,
    %c0_21 = arith.constant 0 : index
    %c1 = arith.constant 1 : index
    %c0_22 = arith.constant 0 : index
    %c0_23 = arith.constant 0 : index
    %27 = vector.load %arg2[%c0_21, %c1, %c0_22, %c0_23] : memref<1x4x8x8xbf16, #tpu.memory_space<vmem>>, vector<1x1x8x8xbf16>
    %28 = vector.shape_cast %27 : vector<1x1x8x8xbf16> to vector<8x8xbf16>
    %c0_24 = arith.constant 0 : index
    %c1_25 = arith.constant 1 : index
    %c0_26 = arith.constant 0 : index
    %c0_27 = arith.constant 0 : index
    %29 = vector.load %arg3[%c0_24, %c1_25, %c0_26, %c0_27] : memref<1x4x8x8xbf16, #tpu.memory_space<vmem>>, vector<1x1x8x8xbf16>
    %30 = vector.shape_cast %29 : vector<1x1x8x8xbf16> to vector<8x8xbf16>
    %c0_28 = arith.constant 0 : index
    %c1_29 = arith.constant 1 : index
    %c0_30 = arith.constant 0 : index
    %c0_31 = arith.constant 0 : index
    %31 = vector.load %arg4[%c0_28, %c1_29, %c0_30, %c0_31] : memref<1x4x8x8xbf16, #tpu.memory_space<vmem>>, vector<1x1x8x8xbf16>
    %32 = vector.shape_cast %31 : vector<1x1x8x8xbf16> to vector<8x8xbf16>
    %cst_32 = arith.constant dense<0.000000e+00> : vector<8x8xf32>
    %33 = tpu.matmul %28, %30, %cst_32 {dimension_numbers = #tpu.dot_dimension_numbers<[1], [1], [0], [0], [0, 0, 1, 0], [], []>} : vector<8x8xbf16>, vector<8x8xbf16>, vector<8x8xf32> -> vector<8x8xf32>
    %34 = vector.broadcast %1 : vector<1x8xf32> to vector<8x8xf32>
    %35 = arith.addf %33, %34 : vector<8x8xf32>
    %cst_33 = arith.constant dense<0xFF800000> : vector<8xf32>
    %36 = vector.multi_reduction <maximumf>, %35, %cst_33 [1] : vector<8x8xf32> to vector<8xf32>
    %37 = vector.shape_cast %36 : vector<8xf32> to vector<8x1xf32>
    %38 = vector.broadcast %37 : vector<8x1xf32> to vector<8x8xf32>
    %39 = arith.subf %35, %38 : vector<8x8xf32>
    %40 = math.exp %39 : vector<8x8xf32>
    %cst_34 = arith.constant dense<0.000000e+00> : vector<8xf32>
    %41 = vector.multi_reduction <add>, %40, %cst_34 [1] : vector<8x8xf32> to vector<8xf32>
    %42 = vector.shape_cast %41 : vector<8xf32> to vector<8x1xf32>
    %cst_35 = arith.constant 1.000000e+00 : f32
    %43 = vector.broadcast %cst_35 : f32 to vector<8x1xf32>
    %44 = arith.divf %43, %42 : vector<8x1xf32>
    %45 = vector.broadcast %44 : vector<8x1xf32> to vector<8x8xf32>
    %46 = arith.mulf %40, %45 : vector<8x8xf32>
    %47 = arith.truncf %46 : vector<8x8xf32> to vector<8x8xbf16>
    %cst_36 = arith.constant dense<0.000000e+00> : vector<8x8xf32>
    %48 = tpu.matmul %47, %32, %cst_36 {dimension_numbers = #tpu.dot_dimension_numbers<[1], [0], [0], [1], [0, 0, 1, 1], [], []>} : vector<8x8xbf16>, vector<8x8xbf16>, vector<8x8xf32> -> vector<8x8xf32>
    %49 = arith.addf %21, %46 : vector<8x8xf32>
    %c0_37 = arith.constant 0 : index
    %c0_38 = arith.constant 0 : index
    %c8 = arith.constant 8 : index
    %50 = vector.load %arg6[%c0_37, %c0_38, %c8] : memref<1x8x32xf32, #tpu.memory_space<vmem>>, vector<1x8x8xf32>
    %51 = vector.shape_cast %50 : vector<1x8x8xf32> to vector<8x8xf32>
    %52 = vector.shape_cast %48 : vector<8x8xf32> to vector<1x8x8xf32>
    tpu.vector_store %arg6[%c0_37, %c0_38, %c8], %52 {strides = array<i32>} : memref<1x8x32xf32, #tpu.memory_space<vmem>>, vector<1x8x8xf32>,
    %c0_39 = arith.constant 0 : index
    %c2 = arith.constant 2 : index
    %c0_40 = arith.constant 0 : index
    %c0_41 = arith.constant 0 : index
    %53 = vector.load %arg2[%c0_39, %c2, %c0_40, %c0_41] : memref<1x4x8x8xbf16, #tpu.memory_space<vmem>>, vector<1x1x8x8xbf16>
    %54 = vector.shape_cast %53 : vector<1x1x8x8xbf16> to vector<8x8xbf16>
    %c0_42 = arith.constant 0 : index
    %c2_43 = arith.constant 2 : index
    %c0_44 = arith.constant 0 : index
    %c0_45 = arith.constant 0 : index
    %55 = vector.load %arg3[%c0_42, %c2_43, %c0_44, %c0_45] : memref<1x4x8x8xbf16, #tpu.memory_space<vmem>>, vector<1x1x8x8xbf16>
    %56 = vector.shape_cast %55 : vector<1x1x8x8xbf16> to vector<8x8xbf16>
    %c0_46 = arith.constant 0 : index
    %c2_47 = arith.constant 2 : index
    %c0_48 = arith.constant 0 : index
    %c0_49 = arith.constant 0 : index
    %57 = vector.load %arg4[%c0_46, %c2_47, %c0_48, %c0_49] : memref<1x4x8x8xbf16, #tpu.memory_space<vmem>>, vector<1x1x8x8xbf16>
    %58 = vector.shape_cast %57 : vector<1x1x8x8xbf16> to vector<8x8xbf16>
    %cst_50 = arith.constant dense<0.000000e+00> : vector<8x8xf32>
    %59 = tpu.matmul %54, %56, %cst_50 {dimension_numbers = #tpu.dot_dimension_numbers<[1], [1], [0], [0], [0, 0, 1, 0], [], []>} : vector<8x8xbf16>, vector<8x8xbf16>, vector<8x8xf32> -> vector<8x8xf32>
    %60 = vector.broadcast %1 : vector<1x8xf32> to vector<8x8xf32>
    %61 = arith.addf %59, %60 : vector<8x8xf32>
    %cst_51 = arith.constant dense<0xFF800000> : vector<8xf32>
    %62 = vector.multi_reduction <maximumf>, %61, %cst_51 [1] : vector<8x8xf32> to vector<8xf32>
    %63 = vector.shape_cast %62 : vector<8xf32> to vector<8x1xf32>
    %64 = vector.broadcast %63 : vector<8x1xf32> to vector<8x8xf32>
    %65 = arith.subf %61, %64 : vector<8x8xf32>
    %66 = math.exp %65 : vector<8x8xf32>
    %cst_52 = arith.constant dense<0.000000e+00> : vector<8xf32>
    %67 = vector.multi_reduction <add>, %66, %cst_52 [1] : vector<8x8xf32> to vector<8xf32>
    %68 = vector.shape_cast %67 : vector<8xf32> to vector<8x1xf32>
    %cst_53 = arith.constant 1.000000e+00 : f32
    %69 = vector.broadcast %cst_53 : f32 to vector<8x1xf32>
    %70 = arith.divf %69, %68 : vector<8x1xf32>
    %71 = vector.broadcast %70 : vector<8x1xf32> to vector<8x8xf32>
    %72 = arith.mulf %66, %71 : vector<8x8xf32>
    %73 = arith.truncf %72 : vector<8x8xf32> to vector<8x8xbf16>
    %cst_54 = arith.constant dense<0.000000e+00> : vector<8x8xf32>
    %74 = tpu.matmul %73, %58, %cst_54 {dimension_numbers = #tpu.dot_dimension_numbers<[1], [0], [0], [1], [0, 0, 1, 1], [], []>} : vector<8x8xbf16>, vector<8x8xbf16>, vector<8x8xf32> -> vector<8x8xf32>
    %75 = arith.addf %49, %72 : vector<8x8xf32>
    %c0_55 = arith.constant 0 : index
    %c0_56 = arith.constant 0 : index
    %c16 = arith.constant 16 : index
    %76 = vector.load %arg6[%c0_55, %c0_56, %c16] : memref<1x8x32xf32, #tpu.memory_space<vmem>>, vector<1x8x8xf32>
    %77 = vector.shape_cast %76 : vector<1x8x8xf32> to vector<8x8xf32>
    %78 = vector.shape_cast %74 : vector<8x8xf32> to vector<1x8x8xf32>
    tpu.vector_store %arg6[%c0_55, %c0_56, %c16], %78 {strides = array<i32>} : memref<1x8x32xf32, #tpu.memory_space<vmem>>, vector<1x8x8xf32>,
    %c0_57 = arith.constant 0 : index
    %c3 = arith.constant 3 : index
    %c0_58 = arith.constant 0 : index
    %c0_59 = arith.constant 0 : index
    %79 = vector.load %arg2[%c0_57, %c3, %c0_58, %c0_59] : memref<1x4x8x8xbf16, #tpu.memory_space<vmem>>, vector<1x1x8x8xbf16>
    %80 = vector.shape_cast %79 : vector<1x1x8x8xbf16> to vector<8x8xbf16>
    %c0_60 = arith.constant 0 : index
    %c3_61 = arith.constant 3 : index
    %c0_62 = arith.constant 0 : index
    %c0_63 = arith.constant 0 : index
    %81 = vector.load %arg3[%c0_60, %c3_61, %c0_62, %c0_63] : memref<1x4x8x8xbf16, #tpu.memory_space<vmem>>, vector<1x1x8x8xbf16>
    %82 = vector.shape_cast %81 : vector<1x1x8x8xbf16> to vector<8x8xbf16>
    %c0_64 = arith.constant 0 : index
    %c3_65 = arith.constant 3 : index
    %c0_66 = arith.constant 0 : index
    %c0_67 = arith.constant 0 : index
    %83 = vector.load %arg4[%c0_64, %c3_65, %c0_66, %c0_67] : memref<1x4x8x8xbf16, #tpu.memory_space<vmem>>, vector<1x1x8x8xbf16>
    %84 = vector.shape_cast %83 : vector<1x1x8x8xbf16> to vector<8x8xbf16>
    %cst_68 = arith.constant dense<0.000000e+00> : vector<8x8xf32>
    %85 = tpu.matmul %80, %82, %cst_68 {dimension_numbers = #tpu.dot_dimension_numbers<[1], [1], [0], [0], [0, 0, 1, 0], [], []>} : vector<8x8xbf16>, vector<8x8xbf16>, vector<8x8xf32> -> vector<8x8xf32>
    %86 = vector.broadcast %1 : vector<1x8xf32> to vector<8x8xf32>
    %87 = arith.addf %85, %86 : vector<8x8xf32>
    %cst_69 = arith.constant dense<0xFF800000> : vector<8xf32>
    %88 = vector.multi_reduction <maximumf>, %87, %cst_69 [1] : vector<8x8xf32> to vector<8xf32>
    %89 = vector.shape_cast %88 : vector<8xf32> to vector<8x1xf32>
    %90 = vector.broadcast %89 : vector<8x1xf32> to vector<8x8xf32>
    %91 = arith.subf %87, %90 : vector<8x8xf32>
    %92 = math.exp %91 : vector<8x8xf32>
    %cst_70 = arith.constant dense<0.000000e+00> : vector<8xf32>
    %93 = vector.multi_reduction <add>, %92, %cst_70 [1] : vector<8x8xf32> to vector<8xf32>
    %94 = vector.shape_cast %93 : vector<8xf32> to vector<8x1xf32>
    %cst_71 = arith.constant 1.000000e+00 : f32
    %95 = vector.broadcast %cst_71 : f32 to vector<8x1xf32>
    %96 = arith.divf %95, %94 : vector<8x1xf32>
    %97 = vector.broadcast %96 : vector<8x1xf32> to vector<8x8xf32>
    %98 = arith.mulf %92, %97 : vector<8x8xf32>
    %99 = arith.truncf %98 : vector<8x8xf32> to vector<8x8xbf16>
    %cst_72 = arith.constant dense<0.000000e+00> : vector<8x8xf32>
    %100 = tpu.matmul %99, %84, %cst_72 {dimension_numbers = #tpu.dot_dimension_numbers<[1], [0], [0], [1], [0, 0, 1, 1], [], []>} : vector<8x8xbf16>, vector<8x8xbf16>, vector<8x8xf32> -> vector<8x8xf32>
    %101 = arith.addf %75, %98 : vector<8x8xf32>
    %c0_73 = arith.constant 0 : index
    %c0_74 = arith.constant 0 : index
    %c24 = arith.constant 24 : index
    %102 = vector.load %arg6[%c0_73, %c0_74, %c24] : memref<1x8x32xf32, #tpu.memory_space<vmem>>, vector<1x8x8xf32>
    %103 = vector.shape_cast %102 : vector<1x8x8xf32> to vector<8x8xf32>
    %104 = vector.shape_cast %100 : vector<8x8xf32> to vector<1x8x8xf32>
    tpu.vector_store %arg6[%c0_73, %c0_74, %c24], %104 {strides = array<i32>} : memref<1x8x32xf32, #tpu.memory_space<vmem>>, vector<1x8x8xf32>,
    %cst_75 = arith.constant 2.500000e-01 : f32
    %105 = vector.broadcast %cst_75 : f32 to vector<8x8xf32>
    %106 = arith.mulf %101, %105 : vector<8x8xf32>
    %c0_76 = arith.constant 0 : index
    %c0_77 = arith.constant 0 : index
    %c0_78 = arith.constant 0 : index
    %107 = vector.load %arg7[%c0_76, %c0_77, %c0_78] : memref<1x8x8xf32, #tpu.memory_space<vmem>>, vector<1x8x8xf32>
    %108 = vector.shape_cast %107 : vector<1x8x8xf32> to vector<8x8xf32>
    %109 = vector.shape_cast %106 : vector<8x8xf32> to vector<1x8x8xf32>
    tpu.vector_store %arg7[%c0_76, %c0_77, %c0_78], %109 {strides = array<i32>} : memref<1x8x8xf32, #tpu.memory_space<vmem>>, vector<1x8x8xf32>,
    return
  }
  func.func @transform_0(%arg0: i32, %arg1: i32) -> (i32, i32, i32, i32) {
    %c0_i32 = arith.constant 0 : i32
    %c0_i32_0 = arith.constant 0 : i32
    %c0_i32_1 = arith.constant 0 : i32
    return %arg0, %c0_i32, %arg1, %c0_i32_0 : i32, i32, i32, i32
  }
  func.func @transform_1(%arg0: i32, %arg1: i32) -> (i32, i32, i32, i32) {
    %c0_i32 = arith.constant 0 : i32
    %c0_i32_0 = arith.constant 0 : i32
    %c0_i32_1 = arith.constant 0 : i32
    %c0_i32_2 = arith.constant 0 : i32
    return %arg0, %c0_i32, %c0_i32_0, %c0_i32_1 : i32, i32, i32, i32
  }
  func.func @transform_2(%arg0: i32, %arg1: i32) -> (i32, i32, i32, i32) {
    %c0_i32 = arith.constant 0 : i32
    %c0_i32_0 = arith.constant 0 : i32
    %c0_i32_1 = arith.constant 0 : i32
    %c0_i32_2 = arith.constant 0 : i32
    return %arg0, %c0_i32, %c0_i32_0, %c0_i32_1 : i32, i32, i32, i32
  }
  func.func @transform_3(%arg0: i32, %arg1: i32) -> (i32, i32, i32) {
    %c0_i32 = arith.constant 0 : i32
    %c0_i32_0 = arith.constant 0 : i32
    %c0_i32_1 = arith.constant 0 : i32
    return %arg0, %c0_i32, %c0_i32_0 : i32, i32, i32
  }
  func.func @transform_4(%arg0: i32, %arg1: i32) -> (i32, i32, i32) {
    %c0_i32 = arith.constant 0 : i32
    %c0_i32_0 = arith.constant 0 : i32
    return %arg0, %arg1, %c0_i32 : i32, i32, i32
  }
  func.func @transform_5(%arg0: i32, %arg1: i32) -> (i32, i32, i32) {
    %c0_i32 = arith.constant 0 : i32
    %c0_i32_0 = arith.constant 0 : i32
    return %arg0, %arg1, %c0_i32 : i32, i32, i32
  }
}

</mosaic_0001>

<bundles_post_ra>
// kernel: tpu_custom_call.1
= control target key start
LH: loop header
LB: loop body
LE: loop exit
PB: predicated region body
PF: predicated region fallthrough
CT: control target
= control target key end

     0   :  { %s1825_s0 = inlined_call_operand.hbm [shape: bf16[2,4,8,8], index: 0, kind: input, shape index: {}]   ;;  %s1826_s1 = inlined_call_operand.hbm [shape: bf16[2,4,8,8], index: 1, kind: input, shape index: {}]   ;;  %s1827_s2 = inlined_call_operand.hbm [shape: bf16[2,4,8,8], index: 2, kind: input, shape index: {}]   ;;  %s1828_s3 = inlined_call_operand.vmem [shape: f32[2,1,8], index: 3, kind: input, shape index: {}]   ;;  %s1829_s4 = inlined_call_operand.hbm [shape: f32[2,8,32], index: 4, kind: output, shape index: {0}]   ;;  %s1830_s5 = inlined_call_operand.hbm [shape: f32[2,8,8], index: 5, kind: output, shape index: {1}]  }
   0x1   :  { %1838 = sst [smem:[#allocation20_spill]] %s1826_s1 }
   0x2   :  { %11 = vsyncpa [#allocation3], 0 }
   0x3   :  { %13 = vsyncpa [#allocation3 + $0x1], 0 }
   0x4   :  { %14 = vsyncpa [#allocation6], 0 }
   0x5   :  { %16 = vsyncpa [#allocation6 + $0x1], 0 }
   0x6   :  { %17 = vsyncpa [#allocation4], 0 }
   0x7   :  { %19 = vsyncpa [#allocation4 + $0x1], 0 }
   0x8   :  { %20 = vsyncpa [#allocation10], 0 }
   0x9   :  { %22 = vsyncpa [#allocation10 + $0x1], 0  ;;  %s1491_s18 = smov 0   ;;  %s1493_s19 = smov 0  }
   0xa   :  { %s1495_s20 = smov 0   ;;  %s1497_s21 = smov 0  }
   0xb   :  { %s1499_s22 = smov 0   ;;  %s1501_s23 = smov 0  }
   0xc LB: > { %1839 = sst [smem:[#allocation15_spill]] %s1427_s18  ;;  %s1522_s24 = sadd.s32 4294967295, %s1447_s23   ;;  %s1447_s23 = sphi %s1501_s23, %s28_s23   ;;  %s1443_s22 = sphi %s1499_s22, %s1858_s22   ;;  %s1439_s21 = sphi %s1497_s21, %s1857_s21   ;;  %s1435_s20 = sphi %s1495_s20, %s1861_s20   ;;  %s1431_s19 = sphi %s1493_s19, %s1860_s19   ;;  %s1427_s18 = sphi %s1491_s18, %s1859_s18  }
   0xd   : > { %1840 = sst [smem:[#allocation16_spill]] %s1443_s22  ;;  %s1040_s25 = sadd.s32 4294967294, %s1447_s23  }
   0xe   : > { %s40_s26 = sadd.s32 1, %s1443_s22  ;;  %s49_s27 = sadd.s32 1, %s1435_s20 }
   0xf   : > { %p42_p0 = scmp.ge.s32.totalorder %s40_s26, 2  ;;  %p56_p1 = scmp.ne.s32.totalorder %s1435_s20, %s1431_s19 }
  0x10   : > { %p57_p2 = scmp.eq.s32.totalorder %s1447_s23, 0  ;;  %p62_p3 = scmp.ne.s32.totalorder %s1431_s19, %s1427_s18 }
  0x11   : > { %s1863_s26 = smov (%p42_p0, %s40_s26), 0  ;;  %p63_p5 = scmp.eq.s32.totalorder %s1522_s24, 0 }
  0x12   : > { %1841 = sst [smem:[#allocation17_spill]] %s1863_s26  ;;  %p1534_p4 = por %p57_p2, %p56_p1 }
  0x13   : > { %s44_s29 = ssub.s32 %s1443_s22, %s1863_s26  ;;  %p166_p6 = scmp.eq.s32.totalorder %s1522_s24, 1 }
  0x14   : > { %p47_p7 = scmp.eq.s32.totalorder %s44_s29, 0  ;;  %p1542_p8 = por %p63_p5, %p62_p3 }
  0x15   : > { %p1546_p9 = por %p166_p6, %p56_p1  ;;  %p172_p10 = scmp.eq.s32.totalorder %s1040_s25, 1 }
  0x16   : > { %s1551_s7 = scalar_select %p47_p7, %s1435_s20, %s49_s27  }
  0x17   : > { %p1553_p11 = por %p172_p10, %p62_p3  ;;  %p1176_p13 = scmp.lt.s32.totalorder %s1447_s23, 2 }
  0x18   : > { %1845 = sst [smem:[#allocation18_spill]] %s1551_s7  ;;  %s1831_s9 = sand.u32 1, %s1435_s20  }
  0x19   : > { %s1846_s8 = scalar_select %p1553_p11, 1, 0 }
  0x1a   : > { %s1562_s10 = sshll.u32 %s1831_s9, 4  ;;  %s1565_s11 = sshll.u32 %s1443_s22, 8 }
  0x1b   : > { %1847 = sst [smem:[#allocation19_spill]] %s1846_s8  ;;  %p1569_p0 = pnand %p1176_p13, %p1534_p4 }
  0x1c   : > { %s242_s13 = sand.u32 1, %s1447_s23   ;;  %s1849_s1 = sld [smem:[#allocation20_spill]] }
  0x1d   : > { %s246_s17 = scalar_lea.vmem [#allocation5], %s1562_s10  ;;  %p1052_p1 = scmp.ge.s32.totalorder %s1447_s23, 1 }
  0x1e   : > { %s253_s25 = sshll.u32 %s246_s17, 4  ;;  %p288_p2 = scmp.lt.s32.totalorder %s1447_s23, 3  ;;  %s254_s25 = int_to_ptr.vmem [resolvable:$true] %s253_s25 }
  0x1f   : > { %s1581_s27 = scalar_lea.sflag [#allocation6], %s242_s13  ;;  %p1251_p3 = pneg %p1569_p0 }
  0x20   : > { %s1262_s28 = scalar_lea.vmem %s254_s25, 256  ;;  %s1449_s29 = smov [#allocation5]  }
  0x21   : > { %p1263_p4 = scmp.ne.s32.totalorder %s254_s25, %s1262_s28  ;;  %s1267_s9 = sshll.u32 %s1449_s29, 4  ;;  %s1268_s9 = int_to_ptr.vmem [resolvable:$false] %s1267_s9 }
  0x22   : > { %s252_s16 = scalar_lea.hbm %s1849_s1, %s1565_s11  ;;  %s1269_s14 = scalar_lea.vmem %s1268_s9, 512 }
  0x23   : > { %p1265_p5 = pnand %p1263_p4, %p1251_p3  ;;  %p1270_p7 = scmp.lt.s32.totalorder %s254_s25, %s1268_s9 }
  0x24   : > { %p1271_p10 = scmp.lt.s32.totalorder %s1269_s14, %s1262_s28 }
  0x25   : > { %p1266_p6 = pneg %p1265_p5 }
  0x26   : > { %p1272_p13 = por %p1271_p10, %p1270_p7 }
  0x28   : > { %p1273_p12 = pnand %p1272_p13, %p1266_p6 }
  0x2a   : > { %1276 = shalt.err (!%p1273_p12)
}
  0x2b   : > { %s1836_s15 = smov 64   ;;  %s1451_s13 = smov 4  }
  0x2c   : > { %1165 = dma.hbm_to_vmem [thread:$0]  (!%p1569_p0), %s252_s16, 256, %s254_s25, %s1581_s27, %s1836_s15, %s1836_s15, %s1451_s13  }
  0x2d   : > { %p1598_p4 = pnand %p1052_p1, %p288_p2  ;;  %s231_s29 = scalar_lea.hbm %s1825_s0, %s1565_s11 }
  0x2e   : > { %s224_s14 = scalar_lea.vmem [#allocation2], %s1562_s10  ;;  %s273_s7 = scalar_lea.hbm %s1827_s2, %s1565_s11 }
  0x2f   : > { %s232_s1 = sshll.u32 %s224_s14, 4  ;;  %s1851_s8 = sand.u32 1, %s1435_s20   ;;  %s233_s1 = int_to_ptr.vmem [resolvable:$true] %s232_s1 }
  0x30   : > { %s221_s18 = scalar_lea.sflag [#allocation3], %s1851_s8  ;;  %s1290_s16 = scalar_lea.vmem %s233_s1, 256 }
  0x31   : > { %p1291_p12 = scmp.ne.s32.totalorder %s233_s1, %s1290_s16  ;;  %s1452_s25 = smov [#allocation2]  }
  0x32   : > { %s1295_s15 = sshll.u32 %s1452_s25, 4  ;;  %s1296_s15 = int_to_ptr.vmem [resolvable:$false] %s1295_s15 }
  0x33   : > { %p1293_p1 = pnand %p1291_p12, %p1251_p3  ;;  %s1297_s17 = scalar_lea.vmem %s1296_s15, 512 }
  0x34   : > { %p1298_p5 = scmp.lt.s32.totalorder %s233_s1, %s1296_s15  ;;  %p1299_p6 = scmp.lt.s32.totalorder %s1297_s17, %s1290_s16 }
  0x35   : > { %p1294_p2 = pneg %p1293_p1 }
  0x36   : > { %p1300_p7 = por %p1299_p6, %p1298_p5 }
  0x38   : > { %p1301_p10 = pnand %p1300_p7, %p1294_p2 }
  0x3a   : > { %1304 = shalt.err (!%p1301_p10)
}
  0x3b   : > { %s1852_s22 = smov 64   ;;  %s267_s26 = scalar_lea.vmem [#allocation7], %s1562_s10 }
  0x3c   : > { %1162 = dma.hbm_to_vmem [thread:$0]  (!%p1569_p0), %s231_s29, 256, %s233_s1, %s221_s18, %s1852_s22, %s1852_s22, %s1451_s13  }
  0x3d   : > { %s274_s8 = sshll.u32 %s267_s26, 4  ;;  %s1453_s15 = smov [#allocation7]   ;;  %s275_s8 = int_to_ptr.vmem [resolvable:$true] %s274_s8 }
  0x3e   : > { %s1318_s28 = scalar_lea.vmem %s275_s8, 256  ;;  %s1323_s14 = sshll.u32 %s1453_s15, 4  ;;  %s1324_s14 = int_to_ptr.vmem [resolvable:$false] %s1323_s14 }
  0x3f   : > { %p1319_p13 = scmp.ne.s32.totalorder %s275_s8, %s1318_s28  ;;  %s1325_s16 = scalar_lea.vmem %s1324_s14, 512 }
  0x40   : > { %p1326_p2 = scmp.lt.s32.totalorder %s275_s8, %s1324_s14  ;;  %p1327_p5 = scmp.lt.s32.totalorder %s1325_s16, %s1318_s28 }
  0x41   : > { %p1321_p12 = pnand %p1319_p13, %p1251_p3 }
  0x42   : > { %p1328_p6 = por %p1327_p5, %p1326_p2 }
  0x43   : > { %p1322_p1 = pneg %p1321_p12 }
  0x45   : > { %p1329_p7 = pnand %p1328_p6, %p1322_p1 }
  0x47   : > { %1332 = shalt.err (!%p1329_p7)
}
  0x48   : > { %1168 = dma.hbm_to_vmem [thread:$0]  (!%p1569_p0), %s273_s7, 256, %s275_s8, %s1581_s27, %s1852_s22, %s1852_s22, %s1451_s13  }
  0x49   : > { %292 = sbr.rel (%p1598_p4) target bundleno = 1465 (0x5b9), region = 36  ;;  %s1639_s10 = sand.u32 (!%p1598_p4), 1, %s1431_s19  }
  0x4a   : > { %s1642_s12 = sshll.u32 (!%p1598_p4), %s1639_s10, 4  ;;  %s295_s29 = scalar_lea.sflag (!%p1598_p4), [#allocation3], %s1639_s10 }
  0x4b   : > { %s1646_s25 = scalar_lea.vmem (!%p1598_p4), [#allocation2], %s1642_s12 }
  0x4e   : > { %1410 = dma.done.wait (%p1542_p8), %s295_s29, 256  }
  0x4f   : > { %1412 = vsyncadd (%p1542_p8), %s295_s29, 4294967040  ;;  %s303_s7 = sand.u32 1, %s1522_s24   ;;  %s1654_s27 = scalar_lea.vmem [#allocation5], %s1642_s12 }
  0x50   : > { %s304_s11 = scalar_lea.sflag [#allocation6], %s303_s7 }
  0x51   : > { %1414 = dma.done.wait (%p1542_p8), %s304_s11, 512  }
  0x52   : > { %1416 = vsyncadd (%p1542_p8), %s304_s11, 4294966784  ;;  %v1454_v0 = vmov 0.0   ;;  %vm1455_vm0 = vmmov 0   ;;  %vm375_vm1 = vcmask 64512   ;;  %v367_v1 = vld [vmem:[%s1654_s27] sm:$0xf] }
  0x53   : > { %1101 = vmatprep.subr.bf16.mxu0 %v1454_v0  ;;  %1103 = vmatprep.mubr.msk.bf16.mxu0 %vm1455_vm0, %v1454_v0  ;;  %v380_v2 = vsel %vm375_vm1, %v367_v1, 0  ;;  %v366_v3 = vld [vmem:[%s1646_s25] sm:$0xf]  ;;  %p361_p8 = scmp.lt.s32.totalorder %s1439_s21, 1  ;;  %vm438_vm2 = vcmask 1043456   ;;  %s1684_s17 = scalar_lea.vmem [#allocation7], %s1642_s12 }
  0x54   : > { %1107 = vmatprep.subr.bf16.mxu1 %v1454_v0  ;;  %1109 = vmatprep.mubr.msk.bf16.mxu1 %vm1455_vm0, %v1454_v0  ;;  %v368_v16 = vld [vmem:[%s1684_s17] sm:$0xf]  ;;  %v1062_v20 = vld [vmem:[%s1654_s27 + $0x4] sm:$0xf]  ;;  %v1067_v24 = vld [vmem:[%s1654_s27 + $0x8] sm:$0xf] }
  0x55   : > { %1102 = vmatpush3.bf16.xpose.msra.mxu0 %v380_v2  ;;  %s362_s24 = scalar_select %p361_p8, %s1439_s21, 1  ;;  %v440_v17 = vsel %vm438_vm2, %v368_v16, 0  ;;  %v493_v23 = vsel %vm375_vm1, %v1062_v20, 0  ;;  %v1061_v25 = vld [vmem:[%s1646_s25 + $0x4] sm:$0xf]  ;;  %v611_v26 = vsel %vm375_vm1, %v1067_v24, 0 }
  0x56   : > { %1119 = vmatprep.subr.bf16.mxu0 %v1454_v0  ;;  %1108 = vmatpush3.bf16.msra.mxu1 %v440_v17  ;;  %v1072_v27 = vld [vmem:[%s1654_s27 + $0xc] sm:$0xf]  ;;  %v1066_v28 = vld [vmem:[%s1646_s25 + $0x8] sm:$0xf]  ;;  %s1056_s22 = sshll.u32 %s1639_s10, 3  ;;  %s1456_s28 = smov 8  }
  0x57   : > { %s363_s9 = scalar_lea.vmem %s1828_s3, %s362_s24  ;;  %1113 = vmatprep.subr.bf16.mxu1 %v1454_v0  ;;  %v729_v29 = vsel %vm375_vm1, %v1072_v27, 0  ;;  %v1071_v30 = vld [vmem:[%s1646_s25 + $0xc] sm:$0xf]  ;;  %s1717_s26 = scalar_lea.vmem [#allocation8], %s1056_s22 }
  0x58   : > { %v1678_v4 = vld [vmem:[%s363_s9] ss:$0 sm:$0xff]  ;;  %v1073_v16 = vld [vmem:[%s1684_s17 + $0xc] sm:$0xf]  ;;  %s360_s8 = scalar_lea.vmem [#allocation9], %s1056_s22  ;;  %s1078_s15 = sshll.u32 %s1439_s21, 7 }
  0x59   : > { %s1755_s1 = scalar_lea.hbm %s1830_s5, %s1078_s15  ;;  %s873_s18 = sshll.u32 %s360_s8, 4  ;;  %s874_s18 = int_to_ptr.vmem [resolvable:$true] %s873_s18 }
  0x5a   : > { %s845_s12 = scalar_lea.sflag [#allocation10], %s1639_s10  ;;  %s1333_s29 = scalar_lea.vmem %s874_s18, 128 }
  0x5b   : > { %p1334_p0 = scmp.ne.s32.totalorder %s874_s18, %s1333_s29  ;;  %s1457_s25 = smov [#allocation9]  }
  0x5c   : > { %1104 = vmatmul.mubr.msk.bf16.vlgmr.msra.gmra.mxu0 %vm375_vm1, %v366_v3  ;;  %s1337_s7 = sshll.u32 %s1457_s25, 4  ;;  %s1338_s7 = int_to_ptr.vmem [resolvable:$false] %s1337_s7 }
  0x5d   : > { %1121 = vmatprep.mubr.msk.bf16.mxu0 %vm1455_vm0, %v1454_v0  ;;  %p1335_p3 = pnand %p1334_p0, %p1546_p9  ;;  %s1339_s11 = scalar_lea.vmem %s1338_s7, 256 }
  0x5e   : > { %p1340_p10 = scmp.lt.s32.totalorder %s874_s18, %s1338_s7  ;;  %p1341_p13 = scmp.lt.s32.totalorder %s1339_s11, %s1333_s29 }
  0x5f   : > { %p1336_p4 = pneg %p1335_p3 }
  0x60   : > { %p1342_p12 = por %p1341_p13, %p1340_p10 }
  0x62   : > { %p1343_p1 = pnand %p1342_p12, %p1336_p4 }
 0x11c   : > { %v416_v5 = vpop.f32.mrf.mxu0 }
 0x11d   : > { %v417_v6 = vadd.f32 %v1678_v4, %v416_v5  ;;  %v1063_v5 = vld [vmem:[%s1684_s17 + $0x4] sm:$0xf] }
 0x11e   : > { %v1105_v7 = vpop.f32.mrf.mxu0 }
 0x11f   : > { %v422_v8 = vsel %vm375_vm1, %v417_v6, -inf }
 0x120   : > { %v419_v9 = vpop.f32.mrf.mxu0  ;;  %423 = vmax.xlane.f32.xlu0 %v422_v8 }
 0x122   : > { %v1106_v10 = vpop.f32.mrf.mxu0 }
 0x123   : > { %v1068_v10 = vld [vmem:[%s1684_s17 + $0x8] sm:$0xf] }
 0x1a9   : > { %v424_v11 = vpop.xlane.xlu0 %423 }
 0x1aa   : > { %v425_v12 = vsub.f32 %v417_v6, %v424_v11  ;;  %v552_v6 = vsel %vm438_vm2, %v1063_v5, 0 }
 0x1ab   : > { %1120 = vmatpush3.bf16.msra.mxu0 %v552_v6 }
 0x1ac   : > { %v426_v13 = vmul.f32 1.442695, %v425_v12  ;;  %1131 = vmatprep.subr.bf16.mxu0 %v1454_v0 }
 0x1ae   : > { %1233 = vpow2.f32 %v426_v13 }
 0x1bb   : > { %v1234_v14 = vpop.eup %1233 }
 0x1bc   : > { %v428_v15 = vsel %vm375_vm1, %v1234_v14, 0.0 }
 0x1bd   : > { %429 = vadd.xlane.f32.xlu0 %v428_v15 }
 0x246   : > { %v430_v18 = vpop.xlane.xlu0 %429 }
 0x247   : > { %1235 = vrcp.f32 %v430_v18 }
 0x254   : > { %v1236_v19 = vpop.eup %1235 }
 0x255   : > { %v1690_v21 = vmul.f32 %v1236_v19, %v1234_v14  ;;  %v670_v14 = vsel %vm438_vm2, %v1068_v10, 0  ;;  %v788_v19 = vsel %vm438_vm2, %v1073_v16, 0 }
 0x257   : > { %v434_v22 = vpack.c.bf16 %v1690_v21, %v1690_v21 }
 0x259   : > { %1110 = vmatmul.mubr.msk.bf16.vlgmr.msra.gmra.mxu1 %vm375_vm1, %v434_v22 }
 0x25a   : > { %1114 = vmatpush3.bf16.xpose.msra.mxu1 %v493_v23  ;;  %1115 = vmatprep.mubr.msk.bf16.mxu1 %vm1455_vm0, %v1454_v0 }
 0x25b   : > { %1125 = vmatprep.subr.bf16.mxu1 %v1454_v0 }
 0x261   : > { %1116 = vmatmul.mubr.msk.bf16.vlgmr.msra.gmra.mxu1 %vm375_vm1, %v1061_v25 }
 0x262   : > { %1126 = vmatpush3.bf16.xpose.msra.mxu1 %v611_v26  ;;  %1127 = vmatprep.mubr.msk.bf16.mxu1 %vm1455_vm0, %v1454_v0 }
 0x263   : > { %1137 = vmatprep.subr.bf16.mxu1 %v1454_v0 }
 0x269   : > { %1128 = vmatmul.mubr.msk.bf16.vlgmr.msra.gmra.mxu1 %vm375_vm1, %v1066_v28 }
 0x26a   : > { %1138 = vmatpush3.bf16.xpose.msra.mxu1 %v729_v29  ;;  %1139 = vmatprep.mubr.msk.bf16.mxu1 %vm1455_vm0, %v1454_v0 }
 0x271   : > { %1140 = vmatmul.mubr.msk.bf16.vlgmr.msra.gmra.mxu1 %vm375_vm1, %v1071_v30 }
 0x319   : > { %v476_v31 = vpop.f32.mrf.mxu1 }
 0x31a   : > { %482 = vst.msk [vmem:[%s1717_s26] sm:$0xff] %vm375_vm1, %v476_v31 }
 0x31b   : > { %v1111_v32 = vpop.f32.mrf.mxu1 }
 0x31d   : > { %v479_v33 = vpop.f32.mrf.mxu1 }
 0x31f   : > { %v1112_v34 = vpop.f32.mrf.mxu1 }
 0x321   : > { %v529_v35 = vpop.f32.mrf.mxu1 }
 0x322   : > { %v530_v36 = vadd.f32 %v1678_v4, %v529_v35 }
 0x323   : > { %v1117_v37 = vpop.f32.mrf.mxu1 }
 0x324   : > { %v535_v38 = vsel %vm375_vm1, %v530_v36, -inf }
 0x325   : > { %536 = vmax.xlane.f32.xlu1 %v535_v38  ;;  %v532_v39 = vpop.f32.mrf.mxu1 }
 0x327   : > { %v1118_v40 = vpop.f32.mrf.mxu1 }
 0x329   : > { %v647_v41 = vpop.f32.mrf.mxu1 }
 0x32a   : > { %v648_v42 = vadd.f32 %v1678_v4, %v647_v41 }
 0x32b   : > { %v1129_v43 = vpop.f32.mrf.mxu1 }
 0x32c   : > { %v653_v44 = vsel %vm375_vm1, %v648_v42, -inf }
 0x32d   : > { %654 = vmax.xlane.f32.xlu1 %v653_v44  ;;  %v650_v45 = vpop.f32.mrf.mxu1 }
 0x32f   : > { %v1130_v46 = vpop.f32.mrf.mxu1 }
 0x331   : > { %v765_v47 = vpop.f32.mrf.mxu1 }
 0x332   : > { %v766_v48 = vadd.f32 %v1678_v4, %v765_v47 }
 0x333   : > { %v1141_v49 = vpop.f32.mrf.mxu1 }
 0x334   : > { %v771_v50 = vsel %vm375_vm1, %v766_v48, -inf }
 0x335   : > { %772 = vmax.xlane.f32.xlu0 %v771_v50  ;;  %v768_v51 = vpop.f32.mrf.mxu1 }
 0x337   : > { %v1142_v52 = vpop.f32.mrf.mxu1 }
 0x3ae   : > { %v537_v53 = vpop.xlane.xlu1 %536 }
 0x3af   : > { %v538_v54 = vsub.f32 %v530_v36, %v537_v53 }
 0x3b1   : > { %v539_v55 = vmul.f32 1.442695, %v538_v54 }
 0x3b3   : > { %1237 = vpow2.f32 %v539_v55 }
 0x3b6   : > { %v655_v56 = vpop.xlane.xlu1 %654 }
 0x3b7   : > { %v656_v57 = vsub.f32 %v648_v42, %v655_v56 }
 0x3b9   : > { %v657_v58 = vmul.f32 1.442695, %v656_v57 }
 0x3bb   : > { %1239 = vpow2.f32 %v657_v58 }
 0x3be   : > { %v773_v59 = vpop.xlane.xlu0 %772 }
 0x3bf   : > { %v774_v60 = vsub.f32 %v766_v48, %v773_v59 }
 0x3c0   : > { %v1238_v61 = vpop.eup %1237 }
 0x3c1   : > { %v775_v62 = vmul.f32 1.442695, %v774_v60  ;;  %v541_v63 = vsel %vm375_vm1, %v1238_v61, 0.0 }
 0x3c2   : > { %542 = vadd.xlane.f32.xlu1 %v541_v63 }
 0x3c3   : > { %1241 = vpow2.f32 %v775_v62 }
 0x3c8   : > { %v1240_v1 = vpop.eup %1239 }
 0x3c9   : > { %v659_v2 = vsel %vm375_vm1, %v1240_v1, 0.0 }
 0x3ca   : > { %660 = vadd.xlane.f32.xlu0 %v659_v2 }
 0x3d0   : > { %v1242_v3 = vpop.eup %1241 }
 0x3d1   : > { %v777_v4 = vsel %vm375_vm1, %v1242_v3, 0.0 }
 0x3d2   : > { %778 = vadd.xlane.f32.xlu1 %v777_v4 }
 0x44b   : > { %v543_v7 = vpop.xlane.xlu1 %542 }
 0x44c   : > { %1243 = vrcp.f32 %v543_v7 }
 0x453   : > { %v661_v8 = vpop.xlane.xlu0 %660 }
 0x454   : > { %1245 = vrcp.f32 %v661_v8 }
 0x459   : > { %v1244_v9 = vpop.eup %1243 }
 0x45a   : > { %v546_v11 = vmul.f32 %v1244_v9, %v1238_v61 }
 0x45b   : > { %v779_v12 = vpop.xlane.xlu1 %778 }
 0x45c   : > { %1247 = vrcp.f32 %v779_v12  ;;  %v547_v13 = vpack.c.bf16 %v546_v11, %v546_v11  ;;  %v594_v20 = vadd.f32 %v546_v11, %v1690_v21 }
 0x45e   : > { %1122 = vmatmul.mubr.msk.bf16.vlgmr.msra.gmra.mxu0 %vm375_vm1, %v547_v13 }
 0x45f   : > { %1132 = vmatpush3.bf16.msra.mxu0 %v670_v14  ;;  %1133 = vmatprep.mubr.msk.bf16.mxu0 %vm1455_vm0, %v1454_v0 }
 0x460   : > { %1143 = vmatprep.subr.bf16.mxu0 %v1454_v0 }
 0x461   : > { %v1246_v15 = vpop.eup %1245 }
 0x462   : > { %v664_v17 = vmul.f32 %v1246_v15, %v1240_v1 }
 0x464   : > { %v665_v18 = vpack.c.bf16 %v664_v17, %v664_v17  ;;  %v712_v23 = vadd.f32 %v664_v17, %v594_v20 }
 0x466   : > { %1134 = vmatmul.mubr.msk.bf16.vlgmr.msra.gmra.mxu0 %vm375_vm1, %v665_v18 }
 0x467   : > { %1144 = vmatpush3.bf16.msra.mxu0 %v788_v19  ;;  %1145 = vmatprep.mubr.msk.bf16.mxu0 %vm1455_vm0, %v1454_v0 }
 0x469   : > { %v1248_v22 = vpop.eup %1247 }
 0x46a   : > { %v782_v24 = vmul.f32 %v1248_v22, %v1242_v3 }
 0x46c   : > { %v783_v25 = vpack.c.bf16 %v782_v24, %v782_v24  ;;  %v830_v26 = vadd.f32 %v782_v24, %v712_v23 }
 0x46e   : > { %1146 = vmatmul.mubr.msk.bf16.vlgmr.msra.gmra.mxu0 %vm375_vm1, %v783_v25  ;;  %v837_v27 = vmul.f32 0.25, %v830_v26 }
 0x470   : > { %838 = vst.msk [vmem:[%s360_s8] sm:$0xff] %vm375_vm1, %v837_v27 }
 0x51e   : > { %v588_v28 = vpop.f32.mrf.mxu0 }
 0x51f   : > { %596 = vrot.lane.b32.xlu0 %v588_v28, %s1456_s28 }
 0x520   : > { %v1123_v0 = vpop.f32.mrf.mxu0 }
 0x522   : > { %v591_v21 = vpop.f32.mrf.mxu0 }
 0x524   : > { %v1124_v29 = vpop.f32.mrf.mxu0 }
 0x526   : > { %v706_v30 = vpop.f32.mrf.mxu0 }
 0x527   : > { %1346 = shalt.err (!%p1343_p1)
}
 0x528   : > { %s1347_s27 = scalar_lea.hbm %s1755_s1, 128  ;;  %s1351_s13 = scalar_lea.hbm %s1830_s5, 256 }
 0x529   : > { %p1348_p2 = scmp.ne.s32.totalorder %s1755_s1, %s1347_s27  ;;  %p1352_p7 = scmp.lt.s32.totalorder %s1755_s1, %s1830_s5 }
 0x52a   : > { %p1353_p8 = scmp.lt.s32.totalorder %s1351_s13, %s1347_s27 }
 0x52b   : > { %p1349_p5 = pnand %p1348_p2, %p1546_p9 }
 0x52c   : > { %p1354_p0 = por %p1353_p8, %p1352_p7 }
 0x52d   : > { %p1350_p6 = pneg %p1349_p5 }
 0x52f   : > { %p1355_p3 = pnand %p1354_p0, %p1350_p6 }
 0x531   : > { %1358 = shalt.err (!%p1355_p3)
}
 0x532   : > { %1156 = dma.vmem_to_hbm [thread:$0]  (%p1546_p9), %s874_s18, 128, %s1755_s1, %s845_s12   ;;  %v1135_v31 = vpop.f32.mrf.mxu0  ;;  %vm599_vm3 = vcmask 130112   ;;  %vm717_vm4 = vcmask 195712   ;;  %vm835_vm5 = vcmask 261312  }
 0x533   : > { %s1458_s22 = smov 16   ;;  %s1459_s8 = smov 24  }
 0x534   : > { %714 = vrot.lane.b32.xlu1 %v706_v30, %s1458_s22  ;;  %v709_v32 = vpop.f32.mrf.mxu0  ;;  %s859_s28 = sshll.u32 %s1717_s26, 4  ;;  %s1782_s1 = scalar_lea.hbm %s1829_s4, %s1078_s15  ;;  %s860_s28 = int_to_ptr.vmem [resolvable:$true] %s859_s28 }
 0x535   : > { %s840_s18 = scalar_lea.sflag [#allocation4], %s1639_s10  ;;  %s1359_s12 = scalar_lea.vmem %s860_s28, 128 }
 0x536   : > { %v1136_v33 = vpop.f32.mrf.mxu0  ;;  %p1360_p4 = scmp.ne.s32.totalorder %s860_s28, %s1359_s12  ;;  %s1460_s29 = smov [#allocation8]  }
 0x537   : > { %s1363_s25 = sshll.u32 %s1460_s29, 4  ;;  %s1364_s25 = int_to_ptr.vmem [resolvable:$false] %s1363_s25 }
 0x538   : > { %v824_v34 = vpop.f32.mrf.mxu0  ;;  %p1361_p10 = pnand %p1360_p4, %p1546_p9  ;;  %s1365_s7 = scalar_lea.vmem %s1364_s25, 256 }
 0x539   : > { %832 = vrot.lane.b32.xlu1 %v824_v34, %s1459_s8  ;;  %p1366_p12 = scmp.lt.s32.totalorder %s860_s28, %s1364_s25  ;;  %p1367_p1 = scmp.lt.s32.totalorder %s1365_s7, %s1359_s12 }
 0x53a   : > { %v1147_v35 = vpop.f32.mrf.mxu0  ;;  %p1362_p13 = pneg %p1361_p10 }
 0x53b   : > { %p1368_p2 = por %p1367_p1, %p1366_p12 }
 0x53c   : > { %v827_v36 = vpop.f32.mrf.mxu0 }
 0x53d   : > { %p1369_p5 = pnand %p1368_p2, %p1362_p13 }
 0x53e   : > { %v1148_v37 = vpop.f32.mrf.mxu0 }
 0x591   : > { %v597_v38 = vpop.permute.xlu0 %596 }
 0x592   : > { %600 = vst.msk [vmem:[%s1717_s26] sm:$0xff] %vm599_vm3, %v597_v38 }
 0x5a6   : > { %v715_v39 = vpop.permute.xlu1 %714 }
 0x5a7   : > { %718 = vst.msk [vmem:[%s1717_s26] sm:$0xff] %vm717_vm4, %v715_v39 }
 0x5ab   : > { %v833_v40 = vpop.permute.xlu1 %832 }
 0x5ac   : > { %836 = vst.msk [vmem:[%s1717_s26] sm:$0xff] %vm835_vm5, %v833_v40 }
 0x5ad   : > { %1372 = shalt.err (!%p1369_p5)
}
 0x5ae   : > { %s1373_s21 = scalar_lea.hbm %s1782_s1, 128  ;;  %s1377_s15 = scalar_lea.hbm %s1829_s4, 256 }
 0x5af   : > { %p1374_p6 = scmp.ne.s32.totalorder %s1782_s1, %s1373_s21  ;;  %p1378_p0 = scmp.lt.s32.totalorder %s1782_s1, %s1829_s4 }
 0x5b0   : > { %p1379_p3 = scmp.lt.s32.totalorder %s1377_s15, %s1373_s21 }
 0x5b1   : > { %p1375_p7 = pnand %p1374_p6, %p1546_p9 }
 0x5b2   : > { %p1380_p4 = por %p1379_p3, %p1378_p0 }
 0x5b3   : > { %p1376_p8 = pneg %p1375_p7 }
 0x5b5   : > { %p1381_p10 = pnand %p1380_p4, %p1376_p8 }
 0x5b7   : > { %1384 = shalt.err (!%p1381_p10)
}
 0x5b8   : > { %1155 = dma.vmem_to_hbm [thread:$0]  (%p1546_p9), %s860_s28, 128, %s1782_s1, %s840_s18  }
 0x5b9 PF: > { %s1853_s24 = sld [smem:[#allocation15_spill]]  ;;  %p1855_p13 = scmp.ge.s32.totalorder %s1447_s23, 2 }
 0x5bb   : > { %p1170_p12 = pnand %p1855_p13, %p1553_p11 }
 0x5bd   : > { %p1171_p1 = pneg %p1170_p12 }
 0x5bf   : > { %s885_s13 = sand.u32 1, %s1853_s24  }
 0x5c0   : > { %s886_s9 = scalar_lea.sflag [#allocation4], %s885_s13 }
 0x5c1   : > { %1418 = dma.done.wait (%p1171_p1), %s886_s9, 128  }
 0x5c2   : > { %1420 = vsyncadd (%p1171_p1), %s886_s9, 4294967168  ;;  %s895_s17 = scalar_lea.sflag [#allocation10], %s885_s13 }
 0x5c3   : > { %1422 = dma.done.wait (%p1171_p1), %s895_s17, 128  }
 0x5c4   : > { %1424 = vsyncadd (%p1171_p1), %s895_s17, 4294967168  ;;  %s28_s23 = sadd.s32 1, %s1447_s23   ;;  %s1856_s6 = sld [smem:[#allocation18_spill]] }
 0x5c5   : > { %p25_p2 = scmp.ge.s32.totalorder %s28_s23, 4   ;;  %s1857_s21 = sld [smem:[#allocation16_spill]] }
 0x5c6   : > { %s1858_s22 = sld [smem:[#allocation17_spill]]  ;;  %s1859_s18 = smov %s1431_s19 }
 0x5c7   : > { %s1860_s19 = smov %s1435_s20  ;;  %27 = sbr.rel (!%p25_p2) target bundleno = 12 (0xc), region = 134 }
 0x5ca   : > { %s1861_s20 = smov %s1856_s6 }
 0x5cc   :  { %900 = vsyncpa [#allocation3], 1 }
 0x5cd   :  { %902 = vsyncpa [#allocation3 + $0x1], 1 }
 0x5ce   :  { %903 = vsyncpa [#allocation6], 1 }
 0x5cf   :  { %905 = vsyncpa [#allocation6 + $0x1], 1 }
 0x5d0   :  { %906 = vsyncpa [#allocation4], 1 }
 0x5d1   :  { %908 = vsyncpa [#allocation4 + $0x1], 1 }
 0x5d2   :  { %909 = vsyncpa [#allocation10], 1 }
 0x5d3   :  { %911 = vsyncpa [#allocation10 + $0x1], 1 }

</bundles_post_ra>
